<compile_context>
chip_gen: v7x
topology: tpu7x:2x2x1
jax: 0.10.0
libtpu: 0.0.40
codegen_flags: <defaults>
</compile_context>

<pallas_src>
import functools

import jax
import jax.numpy as jnp
from jax import lax
from jax.experimental import pallas as pl
from jax.experimental.pallas import tpu as pltpu

BN_EPS = 1e-3
LEAKY_SLOPE = 0.01
LG = 128  # TPU lane-group width


def _ceil_mult(v, m):
    return ((v + m - 1) // m) * m


def _pad_cols(a, cols):
    return jnp.pad(a, ((0, 0), (0, cols - a.shape[1])))


def _pad_rows(a, rows):
    return jnp.pad(a, ((0, rows - a.shape[0]), (0, 0)))


# ----------------------------- kernel -----------------------------

def csvae_kernel(cfg, data_ref, p_ref, out_ref):
    x_dim = cfg["x_dim"]
    y_dim = cfg["y_dim"]
    zw_dim = cfg["zw_dim"]
    x_cols = cfg["x_cols"]
    zw_cols = cfg["zw_cols"]

    def linear(h, meta):
        col, din, dout = meta
        W = p_ref[0:din, col:col + dout]
        b = p_ref[din:din + 1, col:col + dout]
        return jnp.dot(h, W, preferred_element_type=jnp.float32) + b

    def bn_leaky(h, meta):
        col, din, dout = meta
        W = p_ref[0:din, col:col + dout]
        b = p_ref[din:din + 1, col:col + dout]
        g = p_ref[din + 1:din + 2, col:col + dout]
        be = p_ref[din + 2:din + 3, col:col + dout]
        y = jnp.dot(h, W, preferred_element_type=jnp.float32) + b
        # BatchNorm1d train mode: batch mean, biased batch variance (one pass).
        m1 = jnp.mean(y, axis=0, keepdims=True)
        m2 = jnp.mean(y * y, axis=0, keepdims=True)
        var = jnp.maximum(m2 - m1 * m1, 0.0)
        y = g * (y - m1) * lax.rsqrt(var + BN_EPS) + be
        return jnp.where(y > 0, y, LEAKY_SLOPE * y)

    # ---- encoder: first layer consumes the zero-padded x lane group directly ----
    h = data_ref[:, 0:x_cols]
    for meta in cfg["enc"]:
        h = bn_leaky(h, meta)

    # ---- fused latent heads: mu block lanes [0, zw_cols), logvar block
    #      lanes [zw_cols, 2*zw_cols) -> lane-group-aligned split ----
    heads = linear(h, cfg["head"])
    mu_pad = heads[:, 0:zw_cols]
    lv_pad = heads[:, zw_cols:2 * zw_cols]

    # ---- reparameterize z and w jointly (padded lanes stay zero) ----
    eps_pad = data_ref[:, x_cols:x_cols + zw_cols]
    zw_pad = mu_pad + eps_pad * jnp.exp(0.5 * lv_pad)   # [z | w | 0-pad]

    # ---- decoder: first layer consumes the padded [z|w] lane group directly ----
    d = zw_pad
    for meta in cfg["dec"]:
        d = bn_leaky(d, meta)

    x_mu = linear(d, cfg["fc41"])
    # fc6_w's weight rows were placed at the w lanes of the [z|w] lane group.
    y_from_w = linear(zw_pad, cfg["fc6w"])

    # ---- single lane-dense output slab:
    #      [x_mu | z_mu w_mu | z_lv w_lv | z w | y | 0-pad to 128n] ----
    out_ref[...] = jnp.zeros_like(out_ref)
    off = 0
    out_ref[:, off:off + x_dim] = x_mu
    off += x_dim
    out_ref[:, off:off + zw_dim] = heads[:, 0:zw_dim]
    off += zw_dim
    out_ref[:, off:off + zw_dim] = heads[:, zw_cols:zw_cols + zw_dim]
    off += zw_dim
    out_ref[:, off:off + zw_dim] = zw_pad[:, 0:zw_dim]
    off += zw_dim
    out_ref[:, off:off + y_dim] = y_from_w


# ----------------------------- wrapper -----------------------------

def csvae_forward(x, eps_z, eps_w, params):
    hidden = list(params["hidden"])
    B, x_dim = x.shape
    z_dim = eps_z.shape[1]
    w_dim = eps_w.shape[1]
    y_dim = params["fc6_w"][0].shape[1]
    zw_dim = z_dim + w_dim
    x_cols = _ceil_mult(x_dim, LG)
    zw_cols = _ceil_mult(zw_dim, LG)

    # ---- pack every layer into ONE lane-concatenated parameter slab ----
    packs = []
    col = [0]

    def push(pack, din_eff, dout):
        cols_pad = _ceil_mult(pack.shape[1], LG)
        packs.append(_pad_cols(pack, cols_pad))
        meta = (col[0], din_eff, dout)
        col[0] += cols_pad
        return meta

    enc_meta = []
    din = x_dim
    for i, (W, b, g, be) in enumerate(params["enc"]):
        d = W.shape[1]
        de = x_cols if i == 0 else din     # layer 0 eats the padded x lane group
        Wp = _pad_rows(W, de)
        enc_meta.append(push(jnp.concatenate([Wp, b, g, be], axis=0), de, d))
        din = d

    # fused latent heads: [z_mu|w_mu pad-to-128 | z_lv|w_lv pad-to-128]
    W_mu = _pad_cols(jnp.concatenate([params["fc21"][0], params["fc21_w"][0]], axis=1), zw_cols)
    W_lv = _pad_cols(jnp.concatenate([params["fc22"][0], params["fc22_w"][0]], axis=1), zw_cols)
    b_mu = _pad_cols(jnp.concatenate([params["fc21"][1], params["fc21_w"][1]], axis=1), zw_cols)
    b_lv = _pad_cols(jnp.concatenate([params["fc22"][1], params["fc22_w"][1]], axis=1), zw_cols)
    head_pack = jnp.concatenate(
        [jnp.concatenate([W_mu, W_lv], axis=1),
         jnp.concatenate([b_mu, b_lv], axis=1)], axis=0)
    head_meta = push(head_pack, hidden[-1], 2 * zw_cols)

    dec_meta = []
    din = zw_dim
    for i, (W, b, g, be) in enumerate(params["dec"]):
        d = W.shape[1]
        de = zw_cols if i == 0 else din    # layer 0 eats the padded [z|w] lane group
        Wp = _pad_rows(W, de)
        dec_meta.append(push(jnp.concatenate([Wp, b, g, be], axis=0), de, d))
        din = d

    fc41_meta = push(jnp.concatenate(list(params["fc41"]), axis=0), hidden[0], x_dim)

    # fc6_w consumes the padded [z|w] lane group: its rows sit at the w lanes.
    W6 = jnp.zeros((zw_cols, y_dim), jnp.float32).at[z_dim:z_dim + w_dim, :].set(
        params["fc6_w"][0])
    fc6w_meta = push(jnp.concatenate([W6, params["fc6_w"][1]], axis=0), zw_cols, y_dim)

    rows = _ceil_mult(max(p.shape[0] for p in packs), 8)
    param_slab = jnp.concatenate([_pad_rows(p, rows) for p in packs], axis=1)

    # ---- single data slab: [x padded to x_cols | eps_z eps_w padded to zw_cols] ----
    data = jnp.concatenate(
        [_pad_cols(x, x_cols),
         _pad_cols(jnp.concatenate([eps_z, eps_w], axis=1), zw_cols)], axis=1)

    total_out = x_dim + 3 * zw_dim + y_dim
    out_cols = _ceil_mult(total_out, LG)

    cfg = dict(x_dim=x_dim, y_dim=y_dim, z_dim=z_dim, zw_dim=zw_dim,
               x_cols=x_cols, zw_cols=zw_cols,
               enc=tuple(enc_meta), head=head_meta, dec=tuple(dec_meta),
               fc41=fc41_meta, fc6w=fc6w_meta)

    vmem = pltpu.MemorySpace.VMEM
    slab = pl.pallas_call(
        functools.partial(csvae_kernel, cfg),
        out_shape=jax.ShapeDtypeStruct((B, out_cols), jnp.float32),
        in_specs=[pl.BlockSpec(memory_space=vmem),
                  pl.BlockSpec(memory_space=vmem)],
        out_specs=pl.BlockSpec(memory_space=vmem),
    )(data, param_slab)

    # ---- split the lane-dense slab back into the module's 7 outputs ----
    o = 0
    x_mu = slab[:, o:o + x_dim]; o += x_dim
    z_mu = slab[:, o:o + z_dim]; w_mu = slab[:, o + z_dim:o + zw_dim]; o += zw_dim
    z_lv = slab[:, o:o + z_dim]; w_lv = slab[:, o + z_dim:o + zw_dim]; o += zw_dim
    z = slab[:, o:o + z_dim]; o += zw_dim
    y_from_w = slab[:, o:o + y_dim]
    return x_mu, z_mu, z_lv, z, w_mu, w_lv, y_from_w


# ----------------------------- reference (plain JAX) -----------------------------

def csvae_ref(x, eps_z, eps_w, params):
    def bn_leaky(h, g, be):
        mu = h.mean(0, keepdims=True)
        var = ((h - mu) ** 2).mean(0, keepdims=True)
        h = g * (h - mu) / jnp.sqrt(var + BN_EPS) + be
        return jnp.where(h > 0, h, LEAKY_SLOPE * h)

    h = x
    for (w, b, g, be) in params["enc"]:
        h = bn_leaky(h @ w + b, g, be)

    z_mu = h @ params["fc21"][0] + params["fc21"][1]
    z_lv = h @ params["fc22"][0] + params["fc22"][1]
    w_mu = h @ params["fc21_w"][0] + params["fc21_w"][1]
    w_lv = h @ params["fc22_w"][0] + params["fc22_w"][1]

    z = z_mu + eps_z * jnp.exp(0.5 * z_lv)
    w = w_mu + eps_w * jnp.exp(0.5 * w_lv)

    d = jnp.concatenate([z, w], axis=1)
    for (wd, bd, gd, bed) in params["dec"]:
        d = bn_leaky(d @ wd + bd, gd, bed)

    x_mu = d @ params["fc41"][0] + params["fc41"][1]
    y_from_w = w @ params["fc6_w"][0] + params["fc6_w"][1]
    return x_mu, z_mu, z_lv, z, w_mu, w_lv, y_from_w


# ----------------------------- parameter init -----------------------------

def init_params(key, x_dim, y_dim, z_dim, w_dim, hidden_nodes):
    keys = iter(jax.random.split(key, 128))

    def lin(din, dout):
        limit = 1.0 / jnp.sqrt(jnp.float32(din))
        W = jax.random.uniform(next(keys), (din, dout), jnp.float32, -limit, limit)
        b = jax.random.uniform(next(keys), (1, dout), jnp.float32, -limit, limit)
        return W, b

    def bn(d):
        return jnp.ones((1, d), jnp.float32), jnp.zeros((1, d), jnp.float32)

    params = {"hidden": tuple(hidden_nodes)}

    enc = []
    din = x_dim
    for d in hidden_nodes:
        W, b = lin(din, d)
        g, be = bn(d)
        enc.append((W, b, g, be))
        din = d
    params["enc"] = enc

    h_last = hidden_nodes[-1]
    params["fc21"] = lin(h_last, z_dim)
    params["fc22"] = lin(h_last, z_dim)
    params["fc21_w"] = lin(h_last, w_dim)
    params["fc22_w"] = lin(h_last, w_dim)

    dec = []
    din = z_dim + w_dim
    for d in hidden_nodes[::-1]:
        W, b = lin(din, d)
        g, be = bn(d)
        dec.append((W, b, g, be))
        din = d
    params["dec"] = dec

    params["fc41"] = lin(hidden_nodes[0], x_dim)
    params["fc6_w"] = lin(w_dim, y_dim)
    # TODO(synk): fc6 (decode_y) and the negbin dispersion param are unused in
    # forward() with lik='gaussian', so they are omitted here.
    return params


# ----------------------------- main -----------------------------

if __name__ == "__main__":
    B, x_dim, y_dim, z_dim, w_dim = 8, 32, 4, 8, 8
    hidden_nodes = [64, 32]

    root = jax.random.PRNGKey(0)
    k_param, k_x, k_ez, k_ew = jax.random.split(root, 4)

    params = init_params(k_param, x_dim, y_dim, z_dim, w_dim, hidden_nodes)
    x = jax.random.normal(k_x, (B, x_dim), jnp.float32)
    eps_z = jax.random.normal(k_ez, (B, z_dim), jnp.float32)
    eps_w = jax.random.normal(k_ew, (B, w_dim), jnp.float32)

    outs = csvae_forward(x, eps_z, eps_w, params)
    outs = jax.block_until_ready(outs)

    refs = csvae_ref(x, eps_z, eps_w, params)
    names = ["x_mu", "z_mu", "z_logvar", "z", "w_mu", "w_logvar", "y_from_w"]
    for name, o, r in zip(names, outs, refs):
        assert o.shape == r.shape, (name, o.shape, r.shape)
        assert jnp.allclose(o, r, atol=1e-3, rtol=1e-3), (
            name, float(jnp.max(jnp.abs(o - r))))

    print("KERNEL_OK")
</pallas_src>

<mosaic_0001>
module attributes {stable_mosaic.version = 11 : i64} {
  func.func @csvae_kernel(%arg0: memref<8x256xf32, #tpu.memory_space<vmem>>, %arg1: memref<136x1024xf32, #tpu.memory_space<vmem>>, %arg2: memref<8x128xf32, #tpu.memory_space<vmem>>) attributes {dimension_semantics = [], scalar_prefetch = 0 : i64, scratch_operands = 0 : i64, tpu.core_type = #tpu.core_type<tc>} {
    %c0 = arith.constant 0 : index
    %c0_0 = arith.constant 0 : index
    %0 = vector.load %arg0[%c0, %c0_0] : memref<8x256xf32, #tpu.memory_space<vmem>>, vector<8x128xf32>
    %c0_1 = arith.constant 0 : index
    %c0_2 = arith.constant 0 : index
    %1 = vector.load %arg1[%c0_1, %c0_2] : memref<136x1024xf32, #tpu.memory_space<vmem>>, vector<128x64xf32>
    %c128 = arith.constant 128 : index
    %c0_3 = arith.constant 0 : index
    %2 = vector.load %arg1[%c128, %c0_3] : memref<136x1024xf32, #tpu.memory_space<vmem>>, vector<1x64xf32>
    %c129 = arith.constant 129 : index
    %c0_4 = arith.constant 0 : index
    %3 = vector.load %arg1[%c129, %c0_4] : memref<136x1024xf32, #tpu.memory_space<vmem>>, vector<1x64xf32>
    %c130 = arith.constant 130 : index
    %c0_5 = arith.constant 0 : index
    %4 = vector.load %arg1[%c130, %c0_5] : memref<136x1024xf32, #tpu.memory_space<vmem>>, vector<1x64xf32>
    %cst = arith.constant dense<0.000000e+00> : vector<8x64xf32>
    %5 = tpu.matmul %0, %1, %cst {dimension_numbers = #tpu.dot_dimension_numbers<[1], [0], [0], [1], [0, 0, 1, 1], [], []>} : vector<8x128xf32>, vector<128x64xf32>, vector<8x64xf32> -> vector<8x64xf32>
    %6 = vector.broadcast %2 : vector<1x64xf32> to vector<8x64xf32>
    %7 = arith.addf %5, %6 : vector<8x64xf32>
    %cst_6 = arith.constant dense<0.000000e+00> : vector<64xf32>
    %8 = vector.multi_reduction <add>, %7, %cst_6 [0] : vector<8x64xf32> to vector<64xf32>
    %9 = vector.shape_cast %8 : vector<64xf32> to vector<1x64xf32>
    %cst_7 = arith.constant 8.000000e+00 : f32
    %10 = vector.broadcast %cst_7 : f32 to vector<1x64xf32>
    %11 = arith.divf %9, %10 : vector<1x64xf32>
    %12 = arith.mulf %7, %7 : vector<8x64xf32>
    %cst_8 = arith.constant dense<0.000000e+00> : vector<64xf32>
    %13 = vector.multi_reduction <add>, %12, %cst_8 [0] : vector<8x64xf32> to vector<64xf32>
    %14 = vector.shape_cast %13 : vector<64xf32> to vector<1x64xf32>
    %cst_9 = arith.constant 8.000000e+00 : f32
    %15 = vector.broadcast %cst_9 : f32 to vector<1x64xf32>
    %16 = arith.divf %14, %15 : vector<1x64xf32>
    %17 = arith.mulf %11, %11 : vector<1x64xf32>
    %18 = arith.subf %16, %17 : vector<1x64xf32>
    %cst_10 = arith.constant 0.000000e+00 : f32
    %19 = vector.broadcast %cst_10 : f32 to vector<1x64xf32>
    %20 = arith.maximumf %18, %19 : vector<1x64xf32>
    %21 = vector.broadcast %11 : vector<1x64xf32> to vector<8x64xf32>
    %22 = arith.subf %7, %21 : vector<8x64xf32>
    %23 = vector.broadcast %3 : vector<1x64xf32> to vector<8x64xf32>
    %24 = arith.mulf %23, %22 : vector<8x64xf32>
    %cst_11 = arith.constant 1.000000e-03 : f32
    %25 = vector.broadcast %cst_11 : f32 to vector<1x64xf32>
    %26 = arith.addf %20, %25 : vector<1x64xf32>
    %27 = math.rsqrt %26 : vector<1x64xf32>
    %28 = vector.broadcast %27 : vector<1x64xf32> to vector<8x64xf32>
    %29 = arith.mulf %24, %28 : vector<8x64xf32>
    %30 = vector.broadcast %4 : vector<1x64xf32> to vector<8x64xf32>
    %31 = arith.addf %29, %30 : vector<8x64xf32>
    %cst_12 = arith.constant 0.000000e+00 : f32
    %32 = vector.broadcast %cst_12 : f32 to vector<8x64xf32>
    %33 = arith.cmpf ogt, %31, %32 : vector<8x64xf32>
    %cst_13 = arith.constant 0.00999999977 : f32
    %34 = vector.broadcast %cst_13 : f32 to vector<8x64xf32>
    %35 = arith.mulf %34, %31 : vector<8x64xf32>
    %36 = arith.select %33, %31, %35 : vector<8x64xi1>, vector<8x64xf32>
    %c0_14 = arith.constant 0 : index
    %c128_15 = arith.constant 128 : index
    %37 = vector.load %arg1[%c0_14, %c128_15] : memref<136x1024xf32, #tpu.memory_space<vmem>>, vector<64x32xf32>
    %c64 = arith.constant 64 : index
    %c128_16 = arith.constant 128 : index
    %38 = vector.load %arg1[%c64, %c128_16] : memref<136x1024xf32, #tpu.memory_space<vmem>>, vector<1x32xf32>
    %c65 = arith.constant 65 : index
    %c128_17 = arith.constant 128 : index
    %39 = vector.load %arg1[%c65, %c128_17] : memref<136x1024xf32, #tpu.memory_space<vmem>>, vector<1x32xf32>
    %c66 = arith.constant 66 : index
    %c128_18 = arith.constant 128 : index
    %40 = vector.load %arg1[%c66, %c128_18] : memref<136x1024xf32, #tpu.memory_space<vmem>>, vector<1x32xf32>
    %cst_19 = arith.constant dense<0.000000e+00> : vector<8x32xf32>
    %41 = tpu.matmul %36, %37, %cst_19 {dimension_numbers = #tpu.dot_dimension_numbers<[1], [0], [0], [1], [0, 0, 1, 1], [], []>} : vector<8x64xf32>, vector<64x32xf32>, vector<8x32xf32> -> vector<8x32xf32>
    %42 = vector.broadcast %38 : vector<1x32xf32> to vector<8x32xf32>
    %43 = arith.addf %41, %42 : vector<8x32xf32>
    %cst_20 = arith.constant dense<0.000000e+00> : vector<32xf32>
    %44 = vector.multi_reduction <add>, %43, %cst_20 [0] : vector<8x32xf32> to vector<32xf32>
    %45 = vector.shape_cast %44 : vector<32xf32> to vector<1x32xf32>
    %cst_21 = arith.constant 8.000000e+00 : f32
    %46 = vector.broadcast %cst_21 : f32 to vector<1x32xf32>
    %47 = arith.divf %45, %46 : vector<1x32xf32>
    %48 = arith.mulf %43, %43 : vector<8x32xf32>
    %cst_22 = arith.constant dense<0.000000e+00> : vector<32xf32>
    %49 = vector.multi_reduction <add>, %48, %cst_22 [0] : vector<8x32xf32> to vector<32xf32>
    %50 = vector.shape_cast %49 : vector<32xf32> to vector<1x32xf32>
    %cst_23 = arith.constant 8.000000e+00 : f32
    %51 = vector.broadcast %cst_23 : f32 to vector<1x32xf32>
    %52 = arith.divf %50, %51 : vector<1x32xf32>
    %53 = arith.mulf %47, %47 : vector<1x32xf32>
    %54 = arith.subf %52, %53 : vector<1x32xf32>
    %cst_24 = arith.constant 0.000000e+00 : f32
    %55 = vector.broadcast %cst_24 : f32 to vector<1x32xf32>
    %56 = arith.maximumf %54, %55 : vector<1x32xf32>
    %57 = vector.broadcast %47 : vector<1x32xf32> to vector<8x32xf32>
    %58 = arith.subf %43, %57 : vector<8x32xf32>
    %59 = vector.broadcast %39 : vector<1x32xf32> to vector<8x32xf32>
    %60 = arith.mulf %59, %58 : vector<8x32xf32>
    %cst_25 = arith.constant 1.000000e-03 : f32
    %61 = vector.broadcast %cst_25 : f32 to vector<1x32xf32>
    %62 = arith.addf %56, %61 : vector<1x32xf32>
    %63 = math.rsqrt %62 : vector<1x32xf32>
    %64 = vector.broadcast %63 : vector<1x32xf32> to vector<8x32xf32>
    %65 = arith.mulf %60, %64 : vector<8x32xf32>
    %66 = vector.broadcast %40 : vector<1x32xf32> to vector<8x32xf32>
    %67 = arith.addf %65, %66 : vector<8x32xf32>
    %cst_26 = arith.constant 0.000000e+00 : f32
    %68 = vector.broadcast %cst_26 : f32 to vector<8x32xf32>
    %69 = arith.cmpf ogt, %67, %68 : vector<8x32xf32>
    %cst_27 = arith.constant 0.00999999977 : f32
    %70 = vector.broadcast %cst_27 : f32 to vector<8x32xf32>
    %71 = arith.mulf %70, %67 : vector<8x32xf32>
    %72 = arith.select %69, %67, %71 : vector<8x32xi1>, vector<8x32xf32>
    %c0_28 = arith.constant 0 : index
    %c256 = arith.constant 256 : index
    %73 = vector.load %arg1[%c0_28, %c256] : memref<136x1024xf32, #tpu.memory_space<vmem>>, vector<32x256xf32>
    %c32 = arith.constant 32 : index
    %c256_29 = arith.constant 256 : index
    %74 = vector.load %arg1[%c32, %c256_29] : memref<136x1024xf32, #tpu.memory_space<vmem>>, vector<1x256xf32>
    %cst_30 = arith.constant dense<0.000000e+00> : vector<8x256xf32>
    %75 = tpu.matmul %72, %73, %cst_30 {dimension_numbers = #tpu.dot_dimension_numbers<[1], [0], [0], [1], [0, 0, 1, 1], [], []>} : vector<8x32xf32>, vector<32x256xf32>, vector<8x256xf32> -> vector<8x256xf32>
    %76 = vector.broadcast %74 : vector<1x256xf32> to vector<8x256xf32>
    %77 = arith.addf %75, %76 : vector<8x256xf32>
    %78 = vector.extract_strided_slice %77 {offsets = [0, 0], sizes = [8, 128], strides = [1, 1]} : vector<8x256xf32> to vector<8x128xf32>
    %79 = vector.extract_strided_slice %77 {offsets = [0, 128], sizes = [8, 128], strides = [1, 1]} : vector<8x256xf32> to vector<8x128xf32>
    %c0_31 = arith.constant 0 : index
    %c128_32 = arith.constant 128 : index
    %80 = vector.load %arg0[%c0_31, %c128_32] : memref<8x256xf32, #tpu.memory_space<vmem>>, vector<8x128xf32>
    %cst_33 = arith.constant 5.000000e-01 : f32
    %81 = vector.broadcast %cst_33 : f32 to vector<8x128xf32>
    %82 = arith.mulf %81, %79 : vector<8x128xf32>
    %83 = math.exp %82 : vector<8x128xf32>
    %84 = arith.mulf %80, %83 : vector<8x128xf32>
    %85 = arith.addf %78, %84 : vector<8x128xf32>
    %c0_34 = arith.constant 0 : index
    %c512 = arith.constant 512 : index
    %86 = vector.load %arg1[%c0_34, %c512] : memref<136x1024xf32, #tpu.memory_space<vmem>>, vector<128x32xf32>
    %c128_35 = arith.constant 128 : index
    %c512_36 = arith.constant 512 : index
    %87 = vector.load %arg1[%c128_35, %c512_36] : memref<136x1024xf32, #tpu.memory_space<vmem>>, vector<1x32xf32>
    %c129_37 = arith.constant 129 : index
    %c512_38 = arith.constant 512 : index
    %88 = vector.load %arg1[%c129_37, %c512_38] : memref<136x1024xf32, #tpu.memory_space<vmem>>, vector<1x32xf32>
    %c130_39 = arith.constant 130 : index
    %c512_40 = arith.constant 512 : index
    %89 = vector.load %arg1[%c130_39, %c512_40] : memref<136x1024xf32, #tpu.memory_space<vmem>>, vector<1x32xf32>
    %cst_41 = arith.constant dense<0.000000e+00> : vector<8x32xf32>
    %90 = tpu.matmul %85, %86, %cst_41 {dimension_numbers = #tpu.dot_dimension_numbers<[1], [0], [0], [1], [0, 0, 1, 1], [], []>} : vector<8x128xf32>, vector<128x32xf32>, vector<8x32xf32> -> vector<8x32xf32>
    %91 = vector.broadcast %87 : vector<1x32xf32> to vector<8x32xf32>
    %92 = arith.addf %90, %91 : vector<8x32xf32>
    %cst_42 = arith.constant dense<0.000000e+00> : vector<32xf32>
    %93 = vector.multi_reduction <add>, %92, %cst_42 [0] : vector<8x32xf32> to vector<32xf32>
    %94 = vector.shape_cast %93 : vector<32xf32> to vector<1x32xf32>
    %cst_43 = arith.constant 8.000000e+00 : f32
    %95 = vector.broadcast %cst_43 : f32 to vector<1x32xf32>
    %96 = arith.divf %94, %95 : vector<1x32xf32>
    %97 = arith.mulf %92, %92 : vector<8x32xf32>
    %cst_44 = arith.constant dense<0.000000e+00> : vector<32xf32>
    %98 = vector.multi_reduction <add>, %97, %cst_44 [0] : vector<8x32xf32> to vector<32xf32>
    %99 = vector.shape_cast %98 : vector<32xf32> to vector<1x32xf32>
    %cst_45 = arith.constant 8.000000e+00 : f32
    %100 = vector.broadcast %cst_45 : f32 to vector<1x32xf32>
    %101 = arith.divf %99, %100 : vector<1x32xf32>
    %102 = arith.mulf %96, %96 : vector<1x32xf32>
    %103 = arith.subf %101, %102 : vector<1x32xf32>
    %cst_46 = arith.constant 0.000000e+00 : f32
    %104 = vector.broadcast %cst_46 : f32 to vector<1x32xf32>
    %105 = arith.maximumf %103, %104 : vector<1x32xf32>
    %106 = vector.broadcast %96 : vector<1x32xf32> to vector<8x32xf32>
    %107 = arith.subf %92, %106 : vector<8x32xf32>
    %108 = vector.broadcast %88 : vector<1x32xf32> to vector<8x32xf32>
    %109 = arith.mulf %108, %107 : vector<8x32xf32>
    %cst_47 = arith.constant 1.000000e-03 : f32
    %110 = vector.broadcast %cst_47 : f32 to vector<1x32xf32>
    %111 = arith.addf %105, %110 : vector<1x32xf32>
    %112 = math.rsqrt %111 : vector<1x32xf32>
    %113 = vector.broadcast %112 : vector<1x32xf32> to vector<8x32xf32>
    %114 = arith.mulf %109, %113 : vector<8x32xf32>
    %115 = vector.broadcast %89 : vector<1x32xf32> to vector<8x32xf32>
    %116 = arith.addf %114, %115 : vector<8x32xf32>
    %cst_48 = arith.constant 0.000000e+00 : f32
    %117 = vector.broadcast %cst_48 : f32 to vector<8x32xf32>
    %118 = arith.cmpf ogt, %116, %117 : vector<8x32xf32>
    %cst_49 = arith.constant 0.00999999977 : f32
    %119 = vector.broadcast %cst_49 : f32 to vector<8x32xf32>
    %120 = arith.mulf %119, %116 : vector<8x32xf32>
    %121 = arith.select %118, %116, %120 : vector<8x32xi1>, vector<8x32xf32>
    %c0_50 = arith.constant 0 : index
    %c640 = arith.constant 640 : index
    %122 = vector.load %arg1[%c0_50, %c640] : memref<136x1024xf32, #tpu.memory_space<vmem>>, vector<32x64xf32>
    %c32_51 = arith.constant 32 : index
    %c640_52 = arith.constant 640 : index
    %123 = vector.load %arg1[%c32_51, %c640_52] : memref<136x1024xf32, #tpu.memory_space<vmem>>, vector<1x64xf32>
    %c33 = arith.constant 33 : index
    %c640_53 = arith.constant 640 : index
    %124 = vector.load %arg1[%c33, %c640_53] : memref<136x1024xf32, #tpu.memory_space<vmem>>, vector<1x64xf32>
    %c34 = arith.constant 34 : index
    %c640_54 = arith.constant 640 : index
    %125 = vector.load %arg1[%c34, %c640_54] : memref<136x1024xf32, #tpu.memory_space<vmem>>, vector<1x64xf32>
    %cst_55 = arith.constant dense<0.000000e+00> : vector<8x64xf32>
    %126 = tpu.matmul %121, %122, %cst_55 {dimension_numbers = #tpu.dot_dimension_numbers<[1], [0], [0], [1], [0, 0, 1, 1], [], []>} : vector<8x32xf32>, vector<32x64xf32>, vector<8x64xf32> -> vector<8x64xf32>
    %127 = vector.broadcast %123 : vector<1x64xf32> to vector<8x64xf32>
    %128 = arith.addf %126, %127 : vector<8x64xf32>
    %cst_56 = arith.constant dense<0.000000e+00> : vector<64xf32>
    %129 = vector.multi_reduction <add>, %128, %cst_56 [0] : vector<8x64xf32> to vector<64xf32>
    %130 = vector.shape_cast %129 : vector<64xf32> to vector<1x64xf32>
    %cst_57 = arith.constant 8.000000e+00 : f32
    %131 = vector.broadcast %cst_57 : f32 to vector<1x64xf32>
    %132 = arith.divf %130, %131 : vector<1x64xf32>
    %133 = arith.mulf %128, %128 : vector<8x64xf32>
    %cst_58 = arith.constant dense<0.000000e+00> : vector<64xf32>
    %134 = vector.multi_reduction <add>, %133, %cst_58 [0] : vector<8x64xf32> to vector<64xf32>
    %135 = vector.shape_cast %134 : vector<64xf32> to vector<1x64xf32>
    %cst_59 = arith.constant 8.000000e+00 : f32
    %136 = vector.broadcast %cst_59 : f32 to vector<1x64xf32>
    %137 = arith.divf %135, %136 : vector<1x64xf32>
    %138 = arith.mulf %132, %132 : vector<1x64xf32>
    %139 = arith.subf %137, %138 : vector<1x64xf32>
    %cst_60 = arith.constant 0.000000e+00 : f32
    %140 = vector.broadcast %cst_60 : f32 to vector<1x64xf32>
    %141 = arith.maximumf %139, %140 : vector<1x64xf32>
    %142 = vector.broadcast %132 : vector<1x64xf32> to vector<8x64xf32>
    %143 = arith.subf %128, %142 : vector<8x64xf32>
    %144 = vector.broadcast %124 : vector<1x64xf32> to vector<8x64xf32>
    %145 = arith.mulf %144, %143 : vector<8x64xf32>
    %cst_61 = arith.constant 1.000000e-03 : f32
    %146 = vector.broadcast %cst_61 : f32 to vector<1x64xf32>
    %147 = arith.addf %141, %146 : vector<1x64xf32>
    %148 = math.rsqrt %147 : vector<1x64xf32>
    %149 = vector.broadcast %148 : vector<1x64xf32> to vector<8x64xf32>
    %150 = arith.mulf %145, %149 : vector<8x64xf32>
    %151 = vector.broadcast %125 : vector<1x64xf32> to vector<8x64xf32>
    %152 = arith.addf %150, %151 : vector<8x64xf32>
    %cst_62 = arith.constant 0.000000e+00 : f32
    %153 = vector.broadcast %cst_62 : f32 to vector<8x64xf32>
    %154 = arith.cmpf ogt, %152, %153 : vector<8x64xf32>
    %cst_63 = arith.constant 0.00999999977 : f32
    %155 = vector.broadcast %cst_63 : f32 to vector<8x64xf32>
    %156 = arith.mulf %155, %152 : vector<8x64xf32>
    %157 = arith.select %154, %152, %156 : vector<8x64xi1>, vector<8x64xf32>
    %c0_64 = arith.constant 0 : index
    %c768 = arith.constant 768 : index
    %158 = vector.load %arg1[%c0_64, %c768] : memref<136x1024xf32, #tpu.memory_space<vmem>>, vector<64x32xf32>
    %c64_65 = arith.constant 64 : index
    %c768_66 = arith.constant 768 : index
    %159 = vector.load %arg1[%c64_65, %c768_66] : memref<136x1024xf32, #tpu.memory_space<vmem>>, vector<1x32xf32>
    %cst_67 = arith.constant dense<0.000000e+00> : vector<8x32xf32>
    %160 = tpu.matmul %157, %158, %cst_67 {dimension_numbers = #tpu.dot_dimension_numbers<[1], [0], [0], [1], [0, 0, 1, 1], [], []>} : vector<8x64xf32>, vector<64x32xf32>, vector<8x32xf32> -> vector<8x32xf32>
    %161 = vector.broadcast %159 : vector<1x32xf32> to vector<8x32xf32>
    %162 = arith.addf %160, %161 : vector<8x32xf32>
    %c0_68 = arith.constant 0 : index
    %c896 = arith.constant 896 : index
    %163 = vector.load %arg1[%c0_68, %c896] : memref<136x1024xf32, #tpu.memory_space<vmem>>, vector<128x4xf32>
    %c128_69 = arith.constant 128 : index
    %c896_70 = arith.constant 896 : index
    %164 = vector.load %arg1[%c128_69, %c896_70] : memref<136x1024xf32, #tpu.memory_space<vmem>>, vector<1x4xf32>
    %cst_71 = arith.constant dense<0.000000e+00> : vector<8x4xf32>
    %165 = tpu.matmul %85, %163, %cst_71 {dimension_numbers = #tpu.dot_dimension_numbers<[1], [0], [0], [1], [0, 0, 1, 1], [], []>} : vector<8x128xf32>, vector<128x4xf32>, vector<8x4xf32> -> vector<8x4xf32>
    %166 = vector.broadcast %164 : vector<1x4xf32> to vector<8x4xf32>
    %167 = arith.addf %165, %166 : vector<8x4xf32>
    %cst_72 = arith.constant 0.000000e+00 : f32
    %168 = vector.broadcast %cst_72 : f32 to vector<8x128xf32>
    %c0_73 = arith.constant 0 : index
    %c0_74 = arith.constant 0 : index
    %169 = vector.load %arg2[%c0_73, %c0_74] : memref<8x128xf32, #tpu.memory_space<vmem>>, vector<8x128xf32>
    tpu.vector_store %arg2[%c0_73, %c0_74], %168 {strides = array<i32>} : memref<8x128xf32, #tpu.memory_space<vmem>>, vector<8x128xf32>,
    %c0_75 = arith.constant 0 : index
    %c0_76 = arith.constant 0 : index
    %170 = vector.load %arg2[%c0_75, %c0_76] : memref<8x128xf32, #tpu.memory_space<vmem>>, vector<8x32xf32>
    tpu.vector_store %arg2[%c0_75, %c0_76], %162 {strides = array<i32>} : memref<8x128xf32, #tpu.memory_space<vmem>>, vector<8x32xf32>,
    %171 = vector.extract_strided_slice %77 {offsets = [0, 0], sizes = [8, 16], strides = [1, 1]} : vector<8x256xf32> to vector<8x16xf32>
    %c0_77 = arith.constant 0 : index
    %c32_78 = arith.constant 32 : index
    %172 = vector.load %arg2[%c0_77, %c32_78] : memref<8x128xf32, #tpu.memory_space<vmem>>, vector<8x16xf32>
    tpu.vector_store %arg2[%c0_77, %c32_78], %171 {strides = array<i32>} : memref<8x128xf32, #tpu.memory_space<vmem>>, vector<8x16xf32>,
    %173 = vector.extract_strided_slice %77 {offsets = [0, 128], sizes = [8, 16], strides = [1, 1]} : vector<8x256xf32> to vector<8x16xf32>
    %c0_79 = arith.constant 0 : index
    %c48 = arith.constant 48 : index
    %174 = vector.load %arg2[%c0_79, %c48] : memref<8x128xf32, #tpu.memory_space<vmem>>, vector<8x16xf32>
    tpu.vector_store %arg2[%c0_79, %c48], %173 {strides = array<i32>} : memref<8x128xf32, #tpu.memory_space<vmem>>, vector<8x16xf32>,
    %175 = vector.extract_strided_slice %85 {offsets = [0, 0], sizes = [8, 16], strides = [1, 1]} : vector<8x128xf32> to vector<8x16xf32>
    %c0_80 = arith.constant 0 : index
    %c64_81 = arith.constant 64 : index
    %176 = vector.load %arg2[%c0_80, %c64_81] : memref<8x128xf32, #tpu.memory_space<vmem>>, vector<8x16xf32>
    tpu.vector_store %arg2[%c0_80, %c64_81], %175 {strides = array<i32>} : memref<8x128xf32, #tpu.memory_space<vmem>>, vector<8x16xf32>,
    %c0_82 = arith.constant 0 : index
    %c80 = arith.constant 80 : index
    %177 = vector.load %arg2[%c0_82, %c80] : memref<8x128xf32, #tpu.memory_space<vmem>>, vector<8x4xf32>
    tpu.vector_store %arg2[%c0_82, %c80], %167 {strides = array<i32>} : memref<8x128xf32, #tpu.memory_space<vmem>>, vector<8x4xf32>,
    return
  }
}

</mosaic_0001>

<bundles_post_ra>
// kernel: tpu_custom_call.1
= control target key start
LH: loop header
LB: loop body
LE: loop exit
PB: predicated region body
PF: predicated region fallthrough
CT: control target
= control target key end

     0   :  { %7 = vsyncpa [#allocation3], 0  ;;  %s1384_s0 = inlined_call_operand.hbm [shape: f32[8,256], index: 0, kind: input, shape index: {}]   ;;  %s1385_s1 = inlined_call_operand.hbm [shape: f32[136,1024], index: 1, kind: input, shape index: {}]   ;;  %s1386_s2 = inlined_call_operand.hbm [shape: f32[8,128], index: 2, kind: output, shape index: {}]  }
   0x1   :  { %8 = vsyncpa [#allocation6], 0 }
   0x2   :  { %9 = vsyncpa [#allocation4], 0  ;;  %s1247_s9 = smov [#allocation2]   ;;  %s1248_s11 = smov [#allocation5]  }
   0x3   :  { %s16_s10 = sshll.u32 %s1247_s9, 4  ;;  %s25_s12 = sshll.u32 %s1248_s11, 4  ;;  %s17_s10 = int_to_ptr.vmem [resolvable:$true] %s16_s10  ;;  %s1273_s12 = int_to_ptr.vmem [resolvable:$true] %s25_s12 }
   0x4   :  { %s1175_s15 = scalar_lea.hbm %s1384_s0, 256 }
   0x5   :  { %p1176_p0 = scmp.ne.s32.totalorder %s1384_s0, %s1175_s15  ;;  %p1179_p1 = scmp.lt.u32.totalorder %s1175_s15, %s1384_s0 }
   0x7   :  { %p1181_p2 = pnand %p1179_p1, %p1176_p0 }
   0x9   :  { %1184 = shalt.err (!%p1181_p2)
}
   0xa   :  { %s1185_s20 = scalar_lea.vmem %s17_s10, 256  ;;  %p1190_p4 = scmp.lt.s32.totalorder %s17_s10, %s17_s10 }
   0xb   :  { %p1186_p3 = scmp.ne.s32.totalorder %s17_s10, %s1185_s20  ;;  %p1191_p5 = scmp.lt.s32.totalorder %s1185_s20, %s1185_s20 }
   0xd   :  { %p1192_p6 = por %p1191_p5, %p1190_p4 }
   0xf   :  { %p1193_p7 = pnand %p1192_p6, %p1186_p3 }
  0x11   :  { %1196 = shalt.err (!%p1193_p7)
}
  0x12   :  { %19 = dma.hbm_to_vmem [thread:$0]  %s1384_s0, 256, %s17_s10, [#allocation3]  }
  0x13   :  { %s1197_s25 = scalar_lea.hbm %s1385_s1, 17408 }
  0x14   :  { %p1198_p8 = scmp.ne.s32.totalorder %s1385_s1, %s1197_s25  ;;  %p1201_p9 = scmp.lt.u32.totalorder %s1197_s25, %s1385_s1 }
  0x16   :  { %p1203_p10 = pnand %p1201_p9, %p1198_p8 }
  0x18   :  { %1206 = shalt.err (!%p1203_p10)
}
  0x19   :  { %s1207_s30 = scalar_lea.vmem %s1273_s12, 17408  ;;  %p1212_p12 = scmp.lt.s32.totalorder %s1273_s12, %s1273_s12 }
  0x1a   :  { %p1208_p11 = scmp.ne.s32.totalorder %s1273_s12, %s1207_s30  ;;  %p1213_p13 = scmp.lt.s32.totalorder %s1207_s30, %s1207_s30 }
  0x1c   :  { %p1214_p0 = por %p1213_p13, %p1212_p12 }
  0x1e   :  { %p1215_p1 = pnand %p1214_p0, %p1208_p11 }
  0x20   :  { %1218 = shalt.err (!%p1215_p1)
}
  0x21   :  { %s1249_s0 = smov 1024   ;;  %s1250_s3 = smov 64  }
  0x22   :  { %31 = dma.hbm_to_vmem [thread:$0]  %s1385_s1, 17408, %s1273_s12, [#allocation6], %s1249_s0, %s1249_s0, %s1250_s3  }
  0x23   :  { %1241 = dma.done.wait [#allocation3], 256  }
  0x24   :  { %1242 = vsyncadd [#allocation3], 4294967040 }
  0x25   :  { %1243 = dma.done.wait [#allocation6], 17408  }
  0x26   :  { %1244 = vsyncadd [#allocation6], 4294949888  ;;  %v1251_v0 = vmov 0.0|0.0   ;;  %vm1252_vm0 = vmmov 0   ;;  %v1253_v1 = vmov 0.0   ;;  %v39_v2 = vld [vmem:[#allocation5] sm:$0xff] }
  0x27   :  { %1044 = vmatprep.subr.bf16.mxu0 %v1251_v0  ;;  %922 = vmatprep.mubr.msk.f32.mxu0 %vm1252_vm0, %v1253_v1  ;;  %770 = vst [vmem:[#allocation7] sm:$0xff] %v1253_v1  ;;  %v40_v3 = vld [vmem:[#allocation5 + $0x40] sm:$0xff]  ;;  %v38_v26 = vld [vmem:[#allocation2] sm:$0xff]  ;;  %v159_v27 = vld [vmem:[#allocation5 + $0x8] sm:$0xff]  ;;  %vm128_vm1 = vcmask 523264   ;;  %vm243_vm3 = vcmask 261120  }
  0x28   :  { %1068 = vmatprep.subr.bf16.mxu1 %v1251_v0  ;;  %941 = vmatprep.mubr.msk.f32.mxu1 %vm1252_vm0, %v1253_v1  ;;  %v41_v4 = vld [vmem:[#allocation5 + $0x80] sm:$0xff]  ;;  %v1045_v5 = vpack.c.bf16 %v40_v3, %v39_v2  ;;  %v160_v28 = vld [vmem:[#allocation5 + $0x48] sm:$0xff]  ;;  %s1254_s1 = smov 32   ;;  %s1255_s6 = smov 48   ;;  %vm776_vm7 = vcmask 392448   ;;  %vm782_vm8 = vcmask 523648  }
  0x29   :  { %v42_v6 = vld [vmem:[#allocation5 + $0xc0] sm:$0xff]  ;;  %v1069_v29 = vpack.c.bf16 %v160_v28, %v159_v27  ;;  %v161_v30 = vld [vmem:[#allocation5 + $0x88] sm:$0xff]  ;;  %s1256_s7 = smov 80   ;;  %s1257_s8 = smov [#allocation7]   ;;  %vm788_vm9 = vcmask 654848   ;;  %vm794_vm10 = vcmask 687744  }
  0x2a   :  { %1046 = vmatpush3.bf16.msra.mxu0 %v1045_v5  ;;  %v1048_v7 = vpack.c.bf16 %v42_v6, %v41_v4  ;;  %v43_v8 = vld [vmem:[#allocation5 + $0x100] sm:$0xff]  ;;  %v162_v31 = vld [vmem:[#allocation5 + $0xc8] sm:$0xff]  ;;  %s802_s9 = sshll.u32 %s1257_s8, 4  ;;  %s803_s9 = int_to_ptr.vmem [resolvable:$true] %s802_s9 }
  0x2b   :  { %1047 = vmatprep.subr.bf16.mxu0 %v1251_v0  ;;  %v44_v9 = vld [vmem:[#allocation5 + $0x140] sm:$0xff]  ;;  %1070 = vmatpush3.bf16.msra.mxu1 %v1069_v29  ;;  %v1072_v32 = vpack.c.bf16 %v162_v31, %v161_v30  ;;  %v163_v33 = vld [vmem:[#allocation5 + $0x108] sm:$0xff]  ;;  %s1219_s10 = scalar_lea.vmem %s803_s9, 128  ;;  %p1224_p3 = scmp.lt.s32.totalorder %s803_s9, %s803_s9 }
  0x2c   :  { %v1051_v10 = vpack.c.bf16 %v44_v9, %v43_v8  ;;  %v45_v11 = vld [vmem:[#allocation5 + $0x180] sm:$0xff]  ;;  %1071 = vmatprep.subr.bf16.mxu1 %v1251_v0  ;;  %v164_v34 = vld [vmem:[#allocation5 + $0x148] sm:$0xff]  ;;  %p1220_p2 = scmp.ne.s32.totalorder %s803_s9, %s1219_s10  ;;  %p1225_p4 = scmp.lt.s32.totalorder %s1219_s10, %s1219_s10 }
  0x2d   :  { %v46_v12 = vld [vmem:[#allocation5 + $0x1c0] sm:$0xff]  ;;  %v1075_v35 = vpack.c.bf16 %v164_v34, %v163_v33  ;;  %v165_v36 = vld [vmem:[#allocation5 + $0x188] sm:$0xff] }
  0x2e   :  { %1049 = vmatpush3.bf16.msra.mxu0 %v1048_v7  ;;  %v1054_v13 = vpack.c.bf16 %v46_v12, %v45_v11  ;;  %v47_v14 = vld [vmem:[#allocation5 + $0x200] sm:$0xff]  ;;  %v166_v37 = vld [vmem:[#allocation5 + $0x1c8] sm:$0xff]  ;;  %v274_v11 = vld [vmem:[#allocation5 + $0x18] sm:$0xff]  ;;  %p1226_p5 = por %p1225_p4, %p1224_p3 }
  0x2f   :  { %1050 = vmatprep.subr.bf16.mxu0 %v1251_v0  ;;  %v48_v15 = vld [vmem:[#allocation5 + $0x240] sm:$0xff]  ;;  %1073 = vmatpush3.bf16.msra.mxu1 %v1072_v32  ;;  %v1078_v38 = vpack.c.bf16 %v166_v37, %v165_v36  ;;  %v276_v12 = vld [vmem:[#allocation5 + $0x58] sm:$0xff] }
  0x30   :  { %v1057_v16 = vpack.c.bf16 %v48_v15, %v47_v14  ;;  %v49_v17 = vld [vmem:[#allocation5 + $0x280] sm:$0xff]  ;;  %1074 = vmatprep.subr.bf16.mxu1 %v1251_v0  ;;  %v273_v14 = vld [vmem:[#allocation5 + $0x10] sm:$0xff]  ;;  %p1227_p6 = pnand %p1226_p5, %p1220_p2 }
  0x31   :  { %v50_v18 = vld [vmem:[#allocation5 + $0x2c0] sm:$0xff]  ;;  %v275_v15 = vld [vmem:[#allocation5 + $0x50] sm:$0xff] }
  0x32   :  { %1052 = vmatpush3.bf16.msra.mxu0 %v1051_v10  ;;  %v1060_v19 = vpack.c.bf16 %v50_v18, %v49_v17  ;;  %v51_v20 = vld [vmem:[#allocation5 + $0x300] sm:$0xff]  ;;  %v278_v17 = vld [vmem:[#allocation5 + $0x98] sm:$0xff] }
  0x33   :  { %1053 = vmatprep.subr.bf16.mxu0 %v1251_v0  ;;  %v52_v21 = vld [vmem:[#allocation5 + $0x340] sm:$0xff]  ;;  %1076 = vmatpush3.bf16.msra.mxu1 %v1075_v35  ;;  %v280_v18 = vld [vmem:[#allocation5 + $0xd8] sm:$0xff] }
  0x34   :  { %v1063_v22 = vpack.c.bf16 %v52_v21, %v51_v20  ;;  %v53_v23 = vld [vmem:[#allocation5 + $0x380] sm:$0xff]  ;;  %1077 = vmatprep.subr.bf16.mxu1 %v1251_v0  ;;  %v1084_v20 = vpack.c.bf16 %v280_v18, %v278_v17  ;;  %v279_v21 = vld [vmem:[#allocation5 + $0xd0] sm:$0xff] }
  0x35   :  { %v54_v24 = vld [vmem:[#allocation5 + $0x3c0] sm:$0xff] }
  0x36   :  { %1055 = vmatpush3.bf16.msra.mxu0 %v1054_v13  ;;  %v1066_v25 = vpack.c.bf16 %v54_v24, %v53_v23  ;;  %v55_v39 = vld [vmem:[#allocation5 + $0x400] ss:$0 sm:$0xff]  ;;  %v56_v3 = vld [vmem:[#allocation5 + $0x401] ss:$0 sm:$0xff]  ;;  %v57_v6 = vld [vmem:[#allocation5 + $0x402] ss:$0 sm:$0xff]  ;;  %v1080_v13 = vpack.c.bf16 %v276_v12, %v274_v11 }
  0x37   :  { %1056 = vmatprep.subr.bf16.mxu0 %v1251_v0  ;;  %1079 = vmatpush3.bf16.msra.mxu1 %v1078_v38  ;;  %v167_v23 = vld [vmem:[#allocation5 + $0x208] ss:$0 sm:$0xff]  ;;  %v385_v11 = vld [vmem:[#allocation5 + $0x2e0] sm:$0xff] }
  0x38   :  { %1081 = vmatprep.subr.bf16.mxu1 %v1080_v13  ;;  %v386_v13 = vld [vmem:[#allocation5 + $0x320] sm:$0xff] }
  0x39   :  { %v389_v17 = vld [vmem:[#allocation5 + $0x3e0] sm:$0xff] }
  0x3a   :  { %1058 = vmatpush3.bf16.msra.mxu0 %v1057_v16  ;;  %v1082_v16 = vpack.c.bf16 %v275_v15, %v273_v14  ;;  %v387_v14 = vld [vmem:[#allocation5 + $0x360] sm:$0xff] }
  0x3b   :  { %1059 = vmatprep.subr.bf16.mxu0 %v1251_v0  ;;  %v1107_v15 = vpack.c.bf16 %v387_v14, %v386_v13 }
  0x3e   :  { %1061 = vmatpush3.bf16.msra.mxu0 %v1060_v19  ;;  %v277_v19 = vld [vmem:[#allocation5 + $0x90] sm:$0xff] }
  0x3f   :  { %1062 = vmatprep.subr.bf16.mxu0 %v1251_v0 }
  0x42   :  { %1064 = vmatpush3.bf16.msra.mxu0 %v1063_v22  ;;  %v1086_v22 = vpack.c.bf16 %v279_v21, %v277_v19  ;;  %v284_v19 = vlaneseq }
  0x43   :  { %1065 = vmatprep.subr.bf16.mxu0 %v1251_v0 }
  0x46   :  { %1067 = vmatpush3.bf16.msra.mxu0 %v1066_v25 }
  0x47   :  { %1112 = vmatprep.subr.bf16.mxu0 %v1251_v0 }
  0x49   :  { %923 = vmatmul.mubr.f32.vlgmr.msra.gmra.mrb[0].mxu0 %v38_v26 }
  0x4a   :  { %987 = vmatprep.mubr.msk.f32.mxu0 %vm1252_vm0, %v1253_v1 }
 0x11c   :  { %v124_v40 = vpop.f32.mrb[0].mxu0 }
 0x11d   :  { %v125_v41 = vadd.f32 %v124_v40, %v55_v39  ;;  %v924_v42 = vpop.f32.mrb[1].mxu0 }
 0x11f   :  { %v129_v43 = vsel %vm128_vm1, %v125_v41, 0.0  ;;  %v138_v44 = vmul.f32 %v125_v41, %v125_v41 }
 0x120   :  { %v130_v45 = vrot.slane %v129_v43, 4 }
 0x121   :  { %v139_v46 = vsel %vm128_vm1, %v138_v44, 0.0 }
 0x122   :  { %v131_v47 = vadd.f32 %v130_v45, %v129_v43  ;;  %v140_v48 = vrot.slane %v139_v46, 4 }
 0x124   :  { %v132_v49 = vrot.slane %v131_v47, 2  ;;  %v141_v50 = vadd.f32 %v140_v48, %v139_v46 }
 0x126   :  { %v133_v51 = vadd.f32 %v132_v49, %v131_v47  ;;  %v142_v52 = vrot.slane %v141_v50, 2  ;;  %v168_v49 = vld [vmem:[#allocation5 + $0x209] ss:$0 sm:$0xff] }
 0x128   :  { %v134_v53 = vrot.slane %v133_v51, 1  ;;  %v143_v54 = vadd.f32 %v142_v52, %v141_v50  ;;  %v169_v52 = vld [vmem:[#allocation5 + $0x20a] ss:$0 sm:$0xff] }
 0x12a   :  { %v135_v55 = vadd.f32 %v134_v53, %v133_v51  ;;  %v144_v56 = vrot.slane %v143_v54, 1 }
 0x12c   :  { %v137_v57 = vmul.f32 0.125, %v135_v55  ;;  %v145_v58 = vadd.f32 %v144_v56, %v143_v54  ;;  %v374_v54 = vld [vmem:[#allocation5 + $0x20] sm:$0xff] }
 0x12d   :  { %v375_v55 = vld [vmem:[#allocation5 + $0x60] sm:$0xff] }
 0x12e   :  { %v146_v59 = vmul.f32 0.125, %v145_v58  ;;  %v147_v60 = vmul.f32 %v137_v57, %v137_v57  ;;  %v150_v2 = vsub.f32 %v125_v41, %v137_v57  ;;  %v1089_v58 = vpack.c.bf16 %v375_v55, %v374_v54 }
 0x130   :  { %v148_v61 = vsub.f32 %v146_v59, %v147_v60  ;;  %v151_v4 = vmul.f32 %v150_v2, %v56_v3  ;;  %v376_v59 = vld [vmem:[#allocation5 + $0xa0] sm:$0xff] }
 0x131   :  { %v377_v60 = vld [vmem:[#allocation5 + $0xe0] sm:$0xff] }
 0x132   :  { %v149_v62 = vmax.f32 %v148_v61, 0.0  ;;  %v379_v2 = vld [vmem:[#allocation5 + $0x160] sm:$0xff] }
 0x134   :  { %v152_v63 = vadd.f32 0.001, %v149_v62  ;;  %v1092_v62 = vpack.c.bf16 %v377_v60, %v376_v59 }
 0x136   :  { %1165 = vrsqrt.f32 %v152_v63  ;;  %v378_v63 = vld [vmem:[#allocation5 + $0x120] sm:$0xff] }
 0x137   :  { %v1095_v3 = vpack.c.bf16 %v379_v2, %v378_v63 }
 0x140   :  { %v1166_v5 = vpop.eup %1165 }
 0x141   :  { %v154_v7 = vmul.f32 %v1166_v5, %v151_v4  ;;  %v380_v4 = vld [vmem:[#allocation5 + $0x1a0] sm:$0xff] }
 0x142   :  { %v381_v5 = vld [vmem:[#allocation5 + $0x1e0] sm:$0xff] }
 0x143   :  { %v155_v8 = vadd.f32 %v154_v7, %v57_v6  ;;  %v1098_v6 = vpack.c.bf16 %v381_v5, %v380_v4  ;;  %v382_v7 = vld [vmem:[#allocation5 + $0x220] sm:$0xff] }
 0x145   :  { %vm156_vm2 = vcmp.gt.f32.partialorder %v155_v8, 0.0  ;;  %v157_v9 = vmul.f32 0.01, %v155_v8 }
 0x147   :  { %v158_v10 = vsel %vm156_vm2, %v155_v8, %v157_v9  ;;  %v383_v8 = vld [vmem:[#allocation5 + $0x260] sm:$0xff] }
 0x148   :  { %942 = vmatmul.mubr.msk.f32.vlgmr.msra.gmra.mrb[0].mxu1 %vm128_vm1, %v158_v10  ;;  %v1101_v9 = vpack.c.bf16 %v383_v8, %v382_v7  ;;  %v384_v10 = vld [vmem:[#allocation5 + $0x2a0] sm:$0xff] }
 0x149   :  { %361 = vmatprep.mubr.f32.mxu1 %v1253_v1  ;;  %1083 = vmatpush1.bf16.msra.mxu1 %v1082_v16  ;;  %v1104_v12 = vpack.c.bf16 %v385_v11, %v384_v10  ;;  %v388_v16 = vld [vmem:[#allocation5 + $0x3a0] sm:$0xff]  ;;  %v683_v11 = vld [vmem:[#allocation5 + $0x38] sm:$0xff] }
 0x14a   :  { %1085 = vmatprep.subr.bf16.mxu1 %v1084_v20  ;;  %v1110_v18 = vpack.c.bf16 %v389_v17, %v388_v16  ;;  %v285_v20 = vshrl.u32 %v284_v19, 7  ;;  %v685_v16 = vld [vmem:[#allocation5 + $0xb8] sm:$0xff] }
 0x14b   :  { %v686_v17 = vld [vmem:[#allocation5 + $0xf8] sm:$0xff] }
 0x14c   :  { %v286_v21 = vsub.s32 0, %v285_v20  ;;  %v1134_v19 = vpack.c.bf16 %v686_v17, %v685_v16 }
 0x14d   :  { %1087 = vmatpush1.bf16.msra.mxu1 %v1086_v22  ;;  %v282_v22 = vld [vmem:[#allocation5 + $0x110] ss:$8 sm:$0x3] }
 0x14e   :  { %1088 = vmatprep.subr.bf16.mxu1 %v1251_v0 }
 0x21b   :  { %v239_v24 = vpop.f32.mrb[0].mxu1 }
 0x21c   :  { %v240_v25 = vadd.f32 %v239_v24, %v167_v23  ;;  %v943_v26 = vpop.f32.mrb[1].mxu1  ;;  %v290_v23 = vsub.s32 1, %v285_v20  ;;  %v287_v24 = vrot.slane %v282_v22, %v286_v21  ;;  %v687_v20 = vld [vmem:[#allocation5 + $0x138] sm:$0xff] }
 0x21d   :  { %v688_v21 = vld [vmem:[#allocation5 + $0x178] sm:$0xff] }
 0x21e   :  { %v244_v27 = vsel %vm243_vm3, %v240_v25, 0.0  ;;  %v252_v28 = vmul.f32 %v240_v25, %v240_v25 }
 0x21f   :  { %v245_v29 = vrot.slane %v244_v27, 4 }
 0x220   :  { %v253_v30 = vsel %vm243_vm3, %v252_v28, 0.0 }
 0x221   :  { %v246_v31 = vadd.f32 %v245_v29, %v244_v27  ;;  %v254_v32 = vrot.slane %v253_v30, 4 }
 0x223   :  { %v247_v33 = vrot.slane %v246_v31, 2  ;;  %v255_v34 = vadd.f32 %v254_v32, %v253_v30  ;;  %v368_v32 = vld [vmem:[#allocation2 + $0x8] sm:$0xff] }
 0x225   :  { %v248_v35 = vadd.f32 %v247_v33, %v246_v31  ;;  %v256_v36 = vrot.slane %v255_v34, 2 }
 0x227   :  { %v249_v37 = vrot.slane %v248_v35, 1  ;;  %v257_v38 = vadd.f32 %v256_v36, %v255_v34  ;;  %v492_v36 = vld [vmem:[#allocation5 + $0x28] sm:$0xff] }
 0x229   :  { %v250_v39 = vadd.f32 %v249_v37, %v248_v35  ;;  %v258_v40 = vrot.slane %v257_v38, 1  ;;  %v493_v37 = vld [vmem:[#allocation5 + $0x68] sm:$0xff] }
 0x22b   :  { %v251_v41 = vmul.f32 0.125, %v250_v39  ;;  %v259_v42 = vadd.f32 %v258_v40, %v257_v38  ;;  %v1113_v38 = vpack.c.bf16 %v493_v37, %v492_v36  ;;  %v494_v39 = vld [vmem:[#allocation5 + $0xa8] sm:$0xff]  ;;  %v698_v36 = vld [vmem:[#allocation5 + $0x3f8] sm:$0xff] }
 0x22c   :  { %v495_v40 = vld [vmem:[#allocation5 + $0xe8] sm:$0xff] }
 0x22d   :  { %v260_v43 = vmul.f32 0.125, %v259_v42  ;;  %v261_v44 = vmul.f32 %v251_v41, %v251_v41  ;;  %v264_v48 = vsub.f32 %v240_v25, %v251_v41  ;;  %v291_v25 = vrot.slane %v282_v22, %v290_v23  ;;  %1114 = vmatpush3.bf16.msra.mxu0 %v1113_v38  ;;  %v390_v42 = vld [vmem:[#allocation5 + $0x420] ss:$0 sm:$0xff]  ;;  %v689_v23 = vld [vmem:[#allocation5 + $0x1b8] sm:$0xff]  ;;  %v601_v38 = vld [vmem:[#allocation5 + $0x30] sm:$0xff] }
 0x22e   :  { %1115 = vmatprep.subr.bf16.mxu0 %v1251_v0  ;;  %v1116_v41 = vpack.c.bf16 %v495_v40, %v494_v39  ;;  %v1137_v22 = vpack.c.bf16 %v688_v21, %v687_v20  ;;  %v602_v39 = vld [vmem:[#allocation5 + $0x70] sm:$0xff] }
 0x22f   :  { %v262_v45 = vsub.f32 %v260_v43, %v261_v44  ;;  %v265_v50 = vmul.f32 %v264_v48, %v168_v49  ;;  %v1119_v40 = vpack.c.bf16 %v602_v39, %v601_v38 }
 0x231   :  { %v263_v46 = vmax.f32 %v262_v45, 0.0  ;;  %1117 = vmatpush3.bf16.msra.mxu0 %v1116_v41  ;;  %v603_v41 = vld [vmem:[#allocation5 + $0xb0] sm:$0xff] }
 0x232   :  { %1130 = vmatprep.subr.bf16.mxu0 %v1251_v0 }
 0x233   :  { %v266_v47 = vadd.f32 0.001, %v263_v46 }
 0x235   :  { %1167 = vrsqrt.f32 %v266_v47 }
 0x23f   :  { %v1168_v51 = vpop.eup %1167 }
 0x240   :  { %v268_v53 = vmul.f32 %v1168_v51, %v265_v50 }
 0x242   :  { %v269_v56 = vadd.f32 %v268_v53, %v169_v52 }
 0x244   :  { %vm270_vm4 = vcmp.gt.f32.partialorder %v269_v56, 0.0  ;;  %v271_v57 = vmul.f32 0.01, %v269_v56 }
 0x246   :  { %v272_v61 = vsel %vm270_vm4, %v269_v56, %v271_v57 }
 0x247   :  { %813 = vmatmul.mubr.msk.f32.vlgmr.msra.gmra.mrb[2].mxu1 %vm243_vm3, %v272_v61 }
 0x248   :  { %1090 = vmatpush3.bf16.msra.mxu1 %v1089_v58  ;;  %976 = vmatprep.mubr.msk.f32.mxu1 %vm1252_vm0, %v1253_v1 }
 0x249   :  { %1091 = vmatprep.subr.bf16.mxu1 %v1251_v0 }
 0x24c   :  { %1093 = vmatpush3.bf16.msra.mxu1 %v1092_v62 }
 0x24d   :  { %1094 = vmatprep.subr.bf16.mxu1 %v1251_v0 }
 0x250   :  { %1096 = vmatpush3.bf16.msra.mxu1 %v1095_v3 }
 0x251   :  { %1097 = vmatprep.subr.bf16.mxu1 %v1251_v0 }
 0x254   :  { %1099 = vmatpush3.bf16.msra.mxu1 %v1098_v6  ;;  %v391_v6 = vld [vmem:[#allocation5 + $0x421] ss:$0 sm:$0xff] }
 0x255   :  { %1100 = vmatprep.subr.bf16.mxu1 %v1251_v0 }
 0x258   :  { %1102 = vmatpush3.bf16.msra.mxu1 %v1101_v9  ;;  %v392_v9 = vld [vmem:[#allocation5 + $0x422] ss:$0 sm:$0xff] }
 0x259   :  { %1103 = vmatprep.subr.bf16.mxu1 %v1251_v0 }
 0x25c   :  { %1105 = vmatpush3.bf16.msra.mxu1 %v1104_v12  ;;  %v684_v12 = vld [vmem:[#allocation5 + $0x78] sm:$0xff] }
 0x25d   :  { %1106 = vmatprep.subr.bf16.mxu1 %v1251_v0 }
 0x260   :  { %1108 = vmatpush3.bf16.msra.mxu1 %v1107_v15  ;;  %v1131_v15 = vpack.c.bf16 %v684_v12, %v683_v11  ;;  %v699_v11 = vld [vmem:[#allocation5 + $0x438] ss:$0 sm:$0xff] }
 0x261   :  { %1109 = vmatprep.subr.bf16.mxu1 %v1251_v0 }
 0x264   :  { %1111 = vmatpush3.bf16.msra.mxu1 %v1110_v18 }
 0x265   :  { %1118 = vmatprep.subr.bf16.mxu1 %v1251_v0 }
 0x31a   :  { %v363_v26 = vpop.f32.mrb[2].mxu1 }
 0x31b   :  { %v364_v27 = vadd.f32 %v363_v26, %v287_v24  ;;  %v365_v28 = vpop.f32.mrb[3].mxu1  ;;  %v690_v24 = vld [vmem:[#allocation5 + $0x1f8] sm:$0xff] }
 0x31c   :  { %v366_v29 = vadd.f32 %v365_v28, %v291_v25  ;;  %v1140_v25 = vpack.c.bf16 %v690_v24, %v689_v23  ;;  %v691_v26 = vld [vmem:[#allocation5 + $0x238] sm:$0xff] }
 0x31d   :  { %773 = vrot.lane.b32.xlu0 %v364_v27, %s1254_s1 }
 0x31e   :  { %v369_v30 = vmul.f32 0.5, %v366_v29 }
 0x320   :  { %v370_v31 = vmul.f32 1.442695, %v369_v30 }
 0x321   :  { %779 = vrot.lane.b32.xlu0 %v366_v29, %s1255_s6  ;;  %v694_v29 = vld [vmem:[#allocation5 + $0x2f8] sm:$0xff] }
 0x322   :  { %1169 = vpow2.f32 %v370_v31  ;;  %v695_v31 = vld [vmem:[#allocation5 + $0x338] sm:$0xff] }
 0x32c   :  { %v1170_v33 = vpop.eup %1169 }
 0x32d   :  { %v372_v34 = vmul.f32 %v1170_v33, %v368_v32  ;;  %v696_v32 = vld [vmem:[#allocation5 + $0x378] sm:$0xff] }
 0x32e   :  { %v1149_v33 = vpack.c.bf16 %v696_v32, %v695_v31 }
 0x32f   :  { %v1343_v35 = vadd.f32 %v372_v34, %v364_v27  ;;  %v692_v27 = vld [vmem:[#allocation5 + $0x278] sm:$0xff] }
 0x330   :  { %v1143_v28 = vpack.c.bf16 %v692_v27, %v691_v26  ;;  %v697_v34 = vld [vmem:[#allocation5 + $0x3b8] sm:$0xff] }
 0x331   :  { %785 = vrot.lane.b32.xlu1 %v1343_v35, %s1250_s3  ;;  %977 = vmatmul.mubr.f32.vlgmr.msra.gmra.mrb[4].mxu1 %v1343_v35  ;;  %v1152_v37 = vpack.c.bf16 %v698_v36, %v697_v34 }
 0x332   :  { %1006 = vmatprep.mubr.msk.f32.mxu1 %vm1252_vm0, %v1253_v1  ;;  %1120 = vmatpush3.bf16.msra.mxu1 %v1119_v40 }
 0x333   :  { %1121 = vmatprep.subr.bf16.mxu1 %v1251_v0 }
 0x38f   :  { %v774_v24 = vpop.permute.xlu0 %773 }
 0x404   :  { %v459_v43 = vpop.f32.mrb[4].mxu1 }
 0x405   :  { %v460_v44 = vadd.f32 %v459_v43, %v390_v42  ;;  %v978_v45 = vpop.f32.mrb[5].mxu1  ;;  %v604_v42 = vld [vmem:[#allocation5 + $0xf0] sm:$0xff] }
 0x406   :  { %v1122_v43 = vpack.c.bf16 %v604_v42, %v603_v41  ;;  %v606_v45 = vld [vmem:[#allocation5 + $0x170] sm:$0xff] }
 0x407   :  { %v463_v46 = vsel %vm243_vm3, %v460_v44, 0.0  ;;  %v471_v47 = vmul.f32 %v460_v44, %v460_v44 }
 0x408   :  { %v464_v48 = vrot.slane %v463_v46, 4  ;;  %1123 = vmatpush3.bf16.msra.mxu1 %v1122_v43 }
 0x409   :  { %v472_v49 = vsel %vm243_vm3, %v471_v47, 0.0  ;;  %1124 = vmatprep.subr.bf16.mxu1 %v1251_v0  ;;  %v607_v47 = vld [vmem:[#allocation5 + $0x1b0] sm:$0xff] }
 0x40a   :  { %v465_v50 = vadd.f32 %v464_v48, %v463_v46  ;;  %v473_v51 = vrot.slane %v472_v49, 4  ;;  %v608_v48 = vld [vmem:[#allocation5 + $0x1f0] sm:$0xff] }
 0x40c   :  { %v466_v52 = vrot.slane %v465_v50, 2  ;;  %v474_v53 = vadd.f32 %v473_v51, %v472_v49  ;;  %v1128_v49 = vpack.c.bf16 %v608_v48, %v607_v47 }
 0x40e   :  { %v467_v54 = vadd.f32 %v466_v52, %v465_v50  ;;  %v475_v55 = vrot.slane %v474_v53, 2 }
 0x410   :  { %v468_v56 = vrot.slane %v467_v54, 1  ;;  %v476_v57 = vadd.f32 %v475_v55, %v474_v53 }
 0x412   :  { %v469_v58 = vadd.f32 %v468_v56, %v467_v54  ;;  %v477_v59 = vrot.slane %v476_v57, 1 }
 0x414   :  { %v470_v60 = vmul.f32 0.125, %v469_v58  ;;  %v478_v61 = vadd.f32 %v477_v59, %v476_v57 }
 0x416   :  { %v479_v62 = vmul.f32 0.125, %v478_v61  ;;  %v480_v63 = vmul.f32 %v470_v60, %v470_v60  ;;  %v483_v5 = vsub.f32 %v460_v44, %v470_v60  ;;  %v605_v44 = vld [vmem:[#allocation5 + $0x130] sm:$0xff] }
 0x417   :  { %v1125_v46 = vpack.c.bf16 %v606_v45, %v605_v44 }
 0x418   :  { %v481_v2 = vsub.f32 %v479_v62, %v480_v63  ;;  %v484_v7 = vmul.f32 %v483_v5, %v391_v6 }
 0x419   :  { %1126 = vmatpush3.bf16.msra.mxu1 %v1125_v46 }
 0x41a   :  { %v482_v3 = vmax.f32 %v481_v2, 0.0  ;;  %1127 = vmatprep.subr.bf16.mxu1 %v1251_v0 }
 0x41c   :  { %v485_v4 = vadd.f32 0.001, %v482_v3 }
 0x41d   :  { %1129 = vmatpush3.bf16.msra.mxu1 %v1128_v49 }
 0x41e   :  { %1171 = vrsqrt.f32 %v485_v4 }
 0x428   :  { %v1172_v8 = vpop.eup %1171 }
 0x429   :  { %v487_v10 = vmul.f32 %v1172_v8, %v484_v7 }
 0x42b   :  { %v488_v13 = vadd.f32 %v487_v10, %v392_v9 }
 0x42d   :  { %vm489_vm5 = vcmp.gt.f32.partialorder %v488_v13, 0.0  ;;  %v490_v14 = vmul.f32 0.01, %v488_v13 }
 0x42f   :  { %v491_v18 = vsel %vm489_vm5, %v488_v13, %v490_v14  ;;  %v497_v13 = vld [vmem:[#allocation5 + $0x129] ss:$0 sm:$0xff] }
 0x430   :  { %988 = vmatmul.mubr.msk.f32.vlgmr.msra.gmra.mrb[2].mxu0 %vm243_vm3, %v491_v18 }
 0x431   :  { %1132 = vmatpush3.bf16.msra.mxu0 %v1131_v15  ;;  %1041 = vmatprep.mubr.msk.f32.mxu0 %vm1252_vm0, %v1253_v1  ;;  %v693_v1 = vld [vmem:[#allocation5 + $0x2b8] sm:$0xff] }
 0x432   :  { %1133 = vmatprep.subr.bf16.mxu0 %v1251_v0  ;;  %v1146_v30 = vpack.c.bf16 %v694_v29, %v693_v1  ;;  %v786_v1 = vpop.permute.xlu1 %785  ;;  %v780_v29 = vpop.permute.xlu0 %779 }
 0x435   :  { %1135 = vmatpush3.bf16.msra.mxu0 %v1134_v19  ;;  %v498_v19 = vld [vmem:[#allocation5 + $0x12a] ss:$0 sm:$0xff] }
 0x436   :  { %1136 = vmatprep.subr.bf16.mxu0 %v1251_v0 }
 0x439   :  { %1138 = vmatpush3.bf16.msra.mxu0 %v1137_v22 }
 0x43a   :  { %1139 = vmatprep.subr.bf16.mxu0 %v1251_v0 }
 0x43d   :  { %1141 = vmatpush3.bf16.msra.mxu0 %v1140_v25  ;;  %v609_v25 = vld [vmem:[#allocation5 + $0x230] ss:$0 sm:$0xff] }
 0x43e   :  { %1142 = vmatprep.subr.bf16.mxu0 %v1251_v0 }
 0x441   :  { %1144 = vmatpush3.bf16.msra.mxu0 %v1143_v28 }
 0x442   :  { %1145 = vmatprep.subr.bf16.mxu0 %v1251_v0 }
 0x445   :  { %1147 = vmatpush3.bf16.msra.mxu0 %v1146_v30 }
 0x446   :  { %1148 = vmatprep.subr.bf16.mxu0 %v1251_v0 }
 0x449   :  { %1150 = vmatpush3.bf16.msra.mxu0 %v1149_v33 }
 0x44a   :  { %1151 = vmatprep.subr.bf16.mxu0 %v1251_v0 }
 0x44d   :  { %1153 = vmatpush3.bf16.msra.mxu0 %v1152_v37 }
 0x450   :  { %1042 = vmatmul.mubr.f32.vlgmr.msra.gmra.mrb[4].mxu0 %v1343_v35  ;;  %v496_v35 = vld [vmem:[#allocation5 + $0x128] ss:$0 sm:$0xff] }
 0x503   :  { %v568_v50 = vpop.f32.mrb[2].mxu0 }
 0x504   :  { %v569_v51 = vadd.f32 %v568_v50, %v496_v35  ;;  %v989_v52 = vpop.f32.mrb[3].mxu0 }
 0x506   :  { %v572_v53 = vsel %vm128_vm1, %v569_v51, 0.0  ;;  %v580_v54 = vmul.f32 %v569_v51, %v569_v51 }
 0x507   :  { %v573_v55 = vrot.slane %v572_v53, 4 }
 0x508   :  { %v581_v56 = vsel %vm128_vm1, %v580_v54, 0.0 }
 0x509   :  { %v574_v57 = vadd.f32 %v573_v55, %v572_v53  ;;  %v582_v58 = vrot.slane %v581_v56, 4 }
 0x50b   :  { %v575_v59 = vrot.slane %v574_v57, 2  ;;  %v583_v60 = vadd.f32 %v582_v58, %v581_v56 }
 0x50d   :  { %v576_v61 = vadd.f32 %v575_v59, %v574_v57  ;;  %v584_v62 = vrot.slane %v583_v60, 2 }
 0x50f   :  { %v577_v63 = vrot.slane %v576_v61, 1  ;;  %v585_v2 = vadd.f32 %v584_v62, %v583_v60 }
 0x511   :  { %v578_v0 = vadd.f32 %v577_v63, %v576_v61  ;;  %v586_v3 = vrot.slane %v585_v2, 1 }
 0x513   :  { %v579_v4 = vmul.f32 0.125, %v578_v0  ;;  %v587_v5 = vadd.f32 %v586_v3, %v585_v2 }
 0x515   :  { %v588_v6 = vmul.f32 0.125, %v587_v5  ;;  %v589_v7 = vmul.f32 %v579_v4, %v579_v4  ;;  %v592_v12 = vsub.f32 %v569_v51, %v579_v4 }
 0x517   :  { %v590_v8 = vsub.f32 %v588_v6, %v589_v7  ;;  %v593_v17 = vmul.f32 %v592_v12, %v497_v13 }
 0x519   :  { %v591_v9 = vmax.f32 %v590_v8, 0.0 }
 0x51b   :  { %v594_v10 = vadd.f32 0.001, %v591_v9 }
 0x51d   :  { %1173 = vrsqrt.f32 %v594_v10 }
 0x523   :  { %v766_v14 = vpop.f32.mrb[4].mxu0 }
 0x524   :  { %v767_v15 = vadd.f32 %v766_v14, %v699_v11  ;;  %v1043_v16 = vpop.f32.mrb[5].mxu0 }
 0x526   :  { %791 = vrot.lane.b32.xlu1 %v767_v15, %s1256_s7 }
 0x527   :  { %v1174_v18 = vpop.eup %1173 }
 0x528   :  { %v596_v20 = vmul.f32 %v1174_v18, %v593_v17 }
 0x52a   :  { %v597_v21 = vadd.f32 %v596_v20, %v498_v19 }
 0x52c   :  { %vm598_vm6 = vcmp.gt.f32.partialorder %v597_v21, 0.0  ;;  %v599_v22 = vmul.f32 0.01, %v597_v21 }
 0x52e   :  { %v600_v23 = vsel %vm598_vm6, %v597_v21, %v599_v22 }
 0x52f   :  { %1007 = vmatmul.mubr.msk.f32.vlgmr.msra.gmra.mrb[6].mxu1 %vm128_vm1, %v600_v23 }
 0x598   :  { %v792_v30 = vpop.permute.xlu1 %791 }
 0x602   :  { %v679_v26 = vpop.f32.mrb[6].mxu1 }
 0x603   :  { %v680_v27 = vadd.f32 %v679_v26, %v609_v25  ;;  %v1008_v28 = vpop.f32.mrb[7].mxu1 }
 0x605   :  { %771 = vst.msk [vmem:[#allocation7] sm:$0xff] %vm243_vm3, %v680_v27 }
 0x606   :  { %777 = vst.msk [vmem:[#allocation7] sm:$0xff] %vm776_vm7, %v774_v24 }
 0x607   :  { %783 = vst.msk [vmem:[#allocation7] sm:$0xff] %vm782_vm8, %v780_v29 }
 0x608   :  { %789 = vst.msk [vmem:[#allocation7] sm:$0xff] %vm788_vm9, %v786_v1 }
 0x609   :  { %795 = vst.msk [vmem:[#allocation7] sm:$0xff] %vm794_vm10, %v792_v30 }
 0x60a   :  { %1230 = shalt.err (!%p1227_p6)
}
 0x60b   :  { %s1231_s13 = scalar_lea.hbm %s1386_s2, 128 }
 0x60c   :  { %p1232_p7 = scmp.ne.s32.totalorder %s1386_s2, %s1231_s13  ;;  %p1235_p8 = scmp.lt.u32.totalorder %s1231_s13, %s1386_s2 }
 0x60e   :  { %p1237_p9 = pnand %p1235_p8, %p1232_p7 }
 0x610   :  { %1240 = shalt.err (!%p1237_p9)
}
 0x611   :  { %805 = dma.vmem_to_hbm [thread:$0]  %s803_s9, 128, %s1386_s2, [#allocation4]  }
 0x612   :  { %1245 = dma.done.wait [#allocation4], 128  }
 0x613   :  { %1246 = vsyncadd [#allocation4], 4294967168 }
 0x614   :  { %809 = vsyncpa [#allocation3], 1 }
 0x615   :  { %810 = vsyncpa [#allocation6], 1 }
 0x616   :  { %811 = vsyncpa [#allocation4], 1 }

</bundles_post_ra>
